<compile_context>
chip_gen: v7x
topology: tpu7x:2x2x1
jax: 0.10.0
libtpu: 0.0.40
codegen_flags: <defaults>
</compile_context>

<pallas_src>
import functools

import jax
import jax.numpy as jnp
from jax import lax
from jax.experimental import pallas as pl
from jax.experimental.pallas import tpu as pltpu


_LANE = 128
_SUBLANE = 8
# Budget for the double-buffered feature tiles; conservative enough for v7x's
# 64 MiB physical VMEM while still allowing large lane-dense contraction tiles.
_FEATURE_VMEM_BUDGET = 32 * 1024 * 1024
_VMEM_LIMIT_BYTES = 48 * 1024 * 1024


def _round_up(x, mult):
    return ((x + mult - 1) // mult) * mult


def _prep_features(x):
    """NCHW -> (a*b, c*d); keep f32/bf16 as-is, otherwise cast to f32."""
    a, b, c, d = x.shape
    n, m = a * b, c * d
    feats = x.reshape(n, m)
    if feats.dtype != jnp.float32 and feats.dtype != jnp.bfloat16:
        feats = feats.astype(jnp.float32)
    return feats, n, m


def _choose_k_tile(n_p, m, itemsize, k_tile=None):
    """Largest lane-aligned contraction tile that fits the VMEM budget."""
    if k_tile is not None:
        return _round_up(int(k_tile), _LANE)
    max_tk = _FEATURE_VMEM_BUDGET // (2 * n_p * itemsize)   # 2 = double buffer
    max_tk = max(_LANE, (max_tk // _LANE) * _LANE)
    m_aligned = _round_up(m, _LANE)
    return min(m_aligned, max_tk)


def _pad_features(feats, n, m, tk):
    """Zero-pad rows to a sublane multiple and cols to a tk multiple (no-op
    when already aligned -> avoids an extra HBM round trip)."""
    n_pad = (-n) % _SUBLANE
    m_pad = (-m) % tk
    if n_pad or m_pad:
        feats = jnp.pad(feats, ((0, n_pad), (0, m_pad)))
    return feats


# ---------------------------------------------------------------------------
# Target gram matrix (one-time, in __init__): G = (F @ F.T) * scale
# ---------------------------------------------------------------------------
def _gram_kernel(f_ref, g_ref, *, scale):
    k = pl.program_id(0)

    @pl.when(k == 0)
    def _():
        g_ref[...] = jnp.zeros_like(g_ref)

    fb = f_ref[...]
    # Contract dim 1 of both operands (A @ B.T form) -> no transposed copy.
    g_ref[...] += lax.dot_general(
        fb, fb,
        dimension_numbers=(((1,), (1,)), ((), ())),
        preferred_element_type=jnp.float32)

    @pl.when(k == pl.num_programs(0) - 1)
    def _():
        g_ref[...] = g_ref[...] * scale


def _gram_matrix_padded(x, *, k_tile=None):
    """Returns (padded (n_p, n_p) gram, n). Padded rows/cols are exactly 0."""
    a, b, c, d = x.shape
    feats, n, m = _prep_features(x)
    n_p = _round_up(n, _SUBLANE)
    tk = _choose_k_tile(n_p, m, feats.dtype.itemsize, k_tile)
    feats = _pad_features(feats, n, m, tk)
    m_p = feats.shape[1]
    scale = 1.0 / float(a * b * c * d)

    g_padded = pl.pallas_call(
        functools.partial(_gram_kernel, scale=scale),
        out_shape=jax.ShapeDtypeStruct((n_p, n_p), jnp.float32),
        grid_spec=pltpu.PrefetchScalarGridSpec(
            num_scalar_prefetch=0,
            grid=(m_p // tk,),
            in_specs=[pl.BlockSpec((n_p, tk), lambda k: (0, k))],
            out_specs=pl.BlockSpec((n_p, n_p), lambda k: (0, 0)),
        ),
        compiler_params=pltpu.CompilerParams(
            dimension_semantics=("arbitrary",),
            vmem_limit_bytes=_VMEM_LIMIT_BYTES),
    )(feats)
    return g_padded, n


def gram_matrix(x, *, k_tile=None):
    g_padded, n = _gram_matrix_padded(x, k_tile=k_tile)
    return g_padded[:n, :n] if g_padded.shape[0] != n else g_padded


# ---------------------------------------------------------------------------
# Fused per-call kernel: gram row-tile + MSE against the target gram.
# ---------------------------------------------------------------------------
def _style_loss_kernel(f_ref, tgt_ref, loss_ref, acc_ref, *,
                       tn, scale, inv_count):
    i = pl.program_id(0)          # gram row tile ("parallel")
    k = pl.program_id(1)          # contraction step ("arbitrary")

    @pl.when(k == 0)
    def _():
        acc_ref[...] = jnp.zeros_like(acc_ref)

    if f_ref.shape[0] == tn:      # single row tile: use the whole block
        f_rows = f_ref[...]
    else:                         # slice this tile's rows out of the K-tile
        row0 = pl.multiple_of(i * tn, tn)
        f_rows = f_ref[pl.ds(row0, tn), :]

    acc_ref[...] += lax.dot_general(
        f_rows, f_ref[...],
        dimension_numbers=(((1,), (1,)), ((), ())),
        preferred_element_type=jnp.float32)

    @pl.when(k == pl.num_programs(1) - 1)
    def _():
        diff = acc_ref[...] * scale - tgt_ref[...]
        sq = diff * diff
        s = jnp.sum(jnp.sum(sq, axis=1, keepdims=True), axis=0, keepdims=True)
        part = s * inv_count                       # this tile's share of MSE
        loss_ref[...] = jnp.broadcast_to(part.reshape(1, 1, 1), loss_ref.shape)


def _fused_style_loss(x, target_gram_padded, *, k_tile=None):
    a, b, c, d = x.shape
    feats, n, m = _prep_features(x)
    n_p = target_gram_padded.shape[0]
    assert n_p == _round_up(n, _SUBLANE), "input/target gram size mismatch"

    tk = _choose_k_tile(n_p, m, feats.dtype.itemsize, k_tile)
    feats = _pad_features(feats, n, m, tk)
    m_p = feats.shape[1]

    # Row tiling for megacore (v7x): one tile on small problems.
    if n_p > _LANE and n_p % _LANE == 0:
        tn = _LANE
    else:
        tn = n_p
    n_row_tiles = n_p // tn

    scale = 1.0 / float(a * b * c * d)
    inv_count = 1.0 / float(n * n)

    partials = pl.pallas_call(
        functools.partial(_style_loss_kernel, tn=tn, scale=scale,
                          inv_count=inv_count),
        out_shape=jax.ShapeDtypeStruct((n_row_tiles, _SUBLANE, _LANE),
                                       jnp.float32),
        grid_spec=pltpu.PrefetchScalarGridSpec(
            num_scalar_prefetch=0,
            grid=(n_row_tiles, m_p // tk),
            in_specs=[
                pl.BlockSpec((n_p, tk), lambda i, k: (0, k)),   # features
                pl.BlockSpec((tn, n_p), lambda i, k: (i, 0)),   # target gram
            ],
            out_specs=pl.BlockSpec((1, _SUBLANE, _LANE),
                                   lambda i, k: (i, 0, 0)),
            scratch_shapes=[pltpu.VMEM((tn, n_p), jnp.float32)],
        ),
        compiler_params=pltpu.CompilerParams(
            dimension_semantics=("parallel", "arbitrary"),
            vmem_limit_bytes=_VMEM_LIMIT_BYTES),
    )(feats, target_gram_padded)

    # Tiny cross-tile reduction (at most a handful of values).
    return jnp.sum(partials[:, 0, 0])


class StyleLoss:
    """JAX/Pallas port of the PyTorch StyleLoss module."""

    def __init__(self, target_feature):
        # target gram is "detached": it's a plain constant array here.
        g_padded, n = _gram_matrix_padded(target_feature)
        self._target_padded = g_padded      # zero in any padded rows/cols
        self.target = g_padded[:n, :n] if g_padded.shape[0] != n else g_padded
        self.loss = None

    def __call__(self, inp, *, k_tile=None):
        # TODO(synk): stashing self.loss as Python state mirrors the PyTorch
        # module but is not jit-friendly; return the loss instead when jitting.
        self.loss = _fused_style_loss(inp, self._target_padded, k_tile=k_tile)
        return inp


if __name__ == "__main__":
    key = jax.random.PRNGKey(0)
    k1, k2, k3, k4, k5, k6 = jax.random.split(key, 6)

    def ref_loss(x, t):
        def ref_gram(v):
            a, b, c, d = v.shape
            f = v.reshape(a * b, c * d).astype(jnp.float32)
            return (f @ f.T) / float(a * b * c * d)
        return jnp.mean((ref_gram(x) - ref_gram(t)) ** 2)

    # 1) Small NCHW shape per the module spec: (a, b, c, d) = (2, 4, 16, 16).
    tgt1 = jax.random.normal(k1, (2, 4, 16, 16), dtype=jnp.float32)
    x1 = jax.random.normal(k2, (2, 4, 16, 16), dtype=jnp.float32)
    mod1 = StyleLoss(tgt1)
    out1 = mod1(x1)
    jax.block_until_ready(out1)
    jax.block_until_ready(mod1.loss)
    assert jnp.allclose(out1, x1), "forward must return the input unchanged"
    assert jnp.allclose(mod1.loss, ref_loss(x1, tgt1), rtol=2e-4, atol=1e-8), (
        mod1.loss, ref_loss(x1, tgt1))

    # 2) Exercise row tiling (2 row tiles), multi-step K reduction
    #    (forced k_tile=128) and M padding (465 -> 512).
    tgt2 = jax.random.normal(k3, (4, 64, 15, 31), dtype=jnp.float32)
    x2 = jax.random.normal(k4, (4, 64, 15, 31), dtype=jnp.float32)
    mod2 = StyleLoss(tgt2)
    _ = mod2(x2, k_tile=128)
    jax.block_until_ready(mod2.loss)
    assert jnp.allclose(mod2.loss, ref_loss(x2, tgt2), rtol=2e-4, atol=1e-8), (
        mod2.loss, ref_loss(x2, tgt2))

    # 3) Exercise N padding (6 -> 8) and tiny M (35 -> 128).
    tgt3 = jax.random.normal(k5, (3, 2, 5, 7), dtype=jnp.float32)
    x3 = jax.random.normal(k6, (3, 2, 5, 7), dtype=jnp.float32)
    mod3 = StyleLoss(tgt3)
    _ = mod3(x3)
    jax.block_until_ready(mod3.loss)
    assert jnp.allclose(mod3.loss, ref_loss(x3, tgt3), rtol=2e-4, atol=1e-8), (
        mod3.loss, ref_loss(x3, tgt3))

    print("KERNEL_OK")
</pallas_src>

<mosaic_0001>
module attributes {stable_mosaic.version = 11 : i64} {
  func.func @_gram_kernel(%arg0: i32, %arg1: memref<8x256xf32, #tpu.memory_space<vmem>>, %arg2: memref<8x8xf32, #tpu.memory_space<vmem>>) attributes {dimension_semantics = [#tpu.dimension_semantics<arbitrary>], iteration_bounds = array<i64: 1>, scalar_prefetch = 0 : i64, scratch_operands = 0 : i64, tpu.core_type = #tpu.core_type<tc>, window_params = [{transform_indices = @transform_0, window_bounds = array<i64: 8, 256>}, {pipeline_mode = #tpu.pipeline_mode<synchronous>, transform_indices = @transform_1, window_bounds = array<i64: 8, 8>}]} {
    %c0_i32 = arith.constant 0 : i32
    %0 = arith.cmpi eq, %arg0, %c0_i32 : i32
    %1 = arith.extui %0 : i1 to i32
    %c0_i32_0 = arith.constant 0 : i32
    %2 = arith.cmpi ne, %1, %c0_i32_0 : i32
    scf.if %2 {
      %cst_8 = arith.constant 0.000000e+00 : f32
      %11 = vector.broadcast %cst_8 : f32 to vector<8x8xf32>
      %c0_9 = arith.constant 0 : index
      %c0_10 = arith.constant 0 : index
      %12 = vector.load %arg2[%c0_9, %c0_10] : memref<8x8xf32, #tpu.memory_space<vmem>>, vector<8x8xf32>
      tpu.vector_store %arg2[%c0_9, %c0_10], %11 {strides = array<i32>} : memref<8x8xf32, #tpu.memory_space<vmem>>, vector<8x8xf32>,
    } else {
    }
    %c0 = arith.constant 0 : index
    %c0_1 = arith.constant 0 : index
    %3 = vector.load %arg1[%c0, %c0_1] : memref<8x256xf32, #tpu.memory_space<vmem>>, vector<8x256xf32>
    %c0_2 = arith.constant 0 : index
    %c0_3 = arith.constant 0 : index
    %4 = vector.load %arg2[%c0_2, %c0_3] : memref<8x8xf32, #tpu.memory_space<vmem>>, vector<8x8xf32>
    %cst = arith.constant dense<0.000000e+00> : vector<8x8xf32>
    %5 = tpu.matmul %3, %3, %cst {dimension_numbers = #tpu.dot_dimension_numbers<[1], [1], [0], [0], [0, 0, 1, 0], [], []>} : vector<8x256xf32>, vector<8x256xf32>, vector<8x8xf32> -> vector<8x8xf32>
    %6 = arith.addf %4, %5 : vector<8x8xf32>
    %c0_4 = arith.constant 0 : index
    %c0_5 = arith.constant 0 : index
    %7 = vector.load %arg2[%c0_4, %c0_5] : memref<8x8xf32, #tpu.memory_space<vmem>>, vector<8x8xf32>
    tpu.vector_store %arg2[%c0_4, %c0_5], %6 {strides = array<i32>} : memref<8x8xf32, #tpu.memory_space<vmem>>, vector<8x8xf32>,
    %c0_i32_6 = arith.constant 0 : i32
    %8 = arith.cmpi eq, %arg0, %c0_i32_6 : i32
    %9 = arith.extui %8 : i1 to i32
    %c0_i32_7 = arith.constant 0 : i32
    %10 = arith.cmpi ne, %9, %c0_i32_7 : i32
    scf.if %10 {
      %c0_8 = arith.constant 0 : index
      %c0_9 = arith.constant 0 : index
      %11 = vector.load %arg2[%c0_8, %c0_9] : memref<8x8xf32, #tpu.memory_space<vmem>>, vector<8x8xf32>
      %cst_10 = arith.constant 4.8828125E-4 : f32
      %12 = vector.broadcast %cst_10 : f32 to vector<8x8xf32>
      %13 = arith.mulf %11, %12 : vector<8x8xf32>
      %c0_11 = arith.constant 0 : index
      %c0_12 = arith.constant 0 : index
      %14 = vector.load %arg2[%c0_11, %c0_12] : memref<8x8xf32, #tpu.memory_space<vmem>>, vector<8x8xf32>
      tpu.vector_store %arg2[%c0_11, %c0_12], %13 {strides = array<i32>} : memref<8x8xf32, #tpu.memory_space<vmem>>, vector<8x8xf32>,
    } else {
    }
    return
  }
  func.func @transform_0(%arg0: i32) -> (i32, i32) {
    %c0_i32 = arith.constant 0 : i32
    %c0_i32_0 = arith.constant 0 : i32
    return %c0_i32, %arg0 : i32, i32
  }
  func.func @transform_1(%arg0: i32) -> (i32, i32) {
    %c0_i32 = arith.constant 0 : i32
    %c0_i32_0 = arith.constant 0 : i32
    %c0_i32_1 = arith.constant 0 : i32
    return %c0_i32, %c0_i32_0 : i32, i32
  }
}

</mosaic_0001>

<bundles_post_ra>
// kernel: tpu_custom_call.1
= control target key start
LH: loop header
LB: loop body
LE: loop exit
PB: predicated region body
PF: predicated region fallthrough
CT: control target
= control target key end

     0   :  { %6 = vsyncpa [#allocation3], 0  ;;  %s215_s0 = inlined_call_operand.hbm [shape: f32[8,256], index: 0, kind: input, shape index: {}]   ;;  %s216_s1 = inlined_call_operand.hbm [shape: f32[8,8], index: 1, kind: output, shape index: {}]  }
   0x1   :  { %7 = vsyncpa [#allocation4], 0  ;;  %s175_s6 = smov [#allocation2]   ;;  %s127_s10 = scalar_lea.hbm %s215_s0, 256 }
   0x2   :  { %s14_s7 = sshll.u32 %s175_s6, 4  ;;  %p128_p0 = scmp.ne.s32.totalorder %s215_s0, %s127_s10  ;;  %s15_s7 = int_to_ptr.vmem [resolvable:$true] %s14_s7 }
   0x3   :  { %p131_p1 = scmp.lt.u32.totalorder %s127_s10, %s215_s0 }
   0x5   :  { %p133_p2 = pnand %p131_p1, %p128_p0 }
   0x7   :  { %136 = shalt.err (!%p133_p2)
}
   0x8   :  { %s137_s15 = scalar_lea.vmem %s15_s7, 256  ;;  %p142_p4 = scmp.lt.s32.totalorder %s15_s7, %s15_s7 }
   0x9   :  { %p138_p3 = scmp.ne.s32.totalorder %s15_s7, %s137_s15  ;;  %p143_p5 = scmp.lt.s32.totalorder %s137_s15, %s137_s15 }
   0xb   :  { %p144_p6 = por %p143_p5, %p142_p4 }
   0xd   :  { %p145_p7 = pnand %p144_p6, %p138_p3 }
   0xf   :  { %148 = shalt.err (!%p145_p7)
}
  0x10   :  { %17 = dma.hbm_to_vmem [thread:$0]  %s215_s0, 256, %s15_s7, [#allocation3]  }
  0x11   :  { %171 = dma.done.wait [#allocation3], 256  }
  0x12   :  { %172 = vsyncadd [#allocation3], 4294967040  ;;  %vm25_vm0 = vcmask 64512   ;;  %v176_v0 = vmov 0.0   ;;  %v28_v1 = vld [vmem:[#allocation2 + $0x8] sm:$0xff]  ;;  %v27_v2 = vld [vmem:[#allocation2] sm:$0xff] }
  0x13   :  { %26 = vst.msk [vmem:[#allocation5] sm:$0xff] %vm25_vm0, %v176_v0  ;;  %30 = vmatprep.subr.mxu0 %v28_v1  ;;  %94 = vmatprep.mubr.f32.mxu0 %v28_v1  ;;  %s177_s18 = smov [#allocation5]  }
  0x14   :  { %31 = vmatpush1.xpose.msra.mxu0 %v27_v2  ;;  %s115_s0 = sshll.u32 %s177_s18, 4  ;;  %s116_s0 = int_to_ptr.vmem [resolvable:$true] %s115_s0 }
  0x15   :  { %s149_s19 = scalar_lea.vmem %s116_s0, 128  ;;  %p154_p9 = scmp.lt.s32.totalorder %s116_s0, %s116_s0 }
  0x16   :  { %p150_p8 = scmp.ne.s32.totalorder %s116_s0, %s149_s19  ;;  %p155_p10 = scmp.lt.s32.totalorder %s149_s19, %s149_s19 }
  0x17   :  { %95 = vmatmul.mubr.f32.vlgmr.msra.gmra.mrb[0].mxu0 %v27_v2 }
  0x18   :  { %p156_p11 = por %p155_p10, %p154_p9 }
  0x1a   :  { %v29_v3 = vld [vmem:[#allocation5] sm:$0xff]  ;;  %p157_p12 = pnand %p156_p11, %p150_p8 }
  0xea   :  { %v96_v4 = vpop.f32.mrb[0].mxu0 }
  0xeb   :  { %v100_v5 = vadd.f32 %v96_v4, %v29_v3  ;;  %v98_v6 = vpop.f32.mrb[1].mxu0 }
  0xed   :  { %102 = vst.msk [vmem:[#allocation5] sm:$0xff] %vm25_vm0, %v100_v5 }
  0xf4   :  { %v106_v7 = vld [vmem:[#allocation5] sm:$0xff] }
  0xf5   :  { %v107_v8 = vmul.f32 0.00048828125, %v106_v7 }
  0xf7   :  { %108 = vst.msk [vmem:[#allocation5] sm:$0xff] %vm25_vm0, %v107_v8 }
  0xf8   :  { %160 = shalt.err (!%p157_p12)
}
  0xf9   :  { %s161_s22 = scalar_lea.hbm %s216_s1, 128 }
  0xfa   :  { %p162_p13 = scmp.ne.s32.totalorder %s216_s1, %s161_s22  ;;  %p165_p0 = scmp.lt.u32.totalorder %s161_s22, %s216_s1 }
  0xfc   :  { %p167_p1 = pnand %p165_p0, %p162_p13 }
  0xfe   :  { %170 = shalt.err (!%p167_p1)
}
  0xff   :  { %118 = dma.vmem_to_hbm [thread:$0]  %s116_s0, 128, %s216_s1, [#allocation4]  }
 0x100   :  { %173 = dma.done.wait [#allocation4], 128  }
 0x101   :  { %174 = vsyncadd [#allocation4], 4294967168 }
 0x102   :  { %122 = vsyncpa [#allocation3], 1 }
 0x103   :  { %123 = vsyncpa [#allocation4], 1 }

</bundles_post_ra>
